<compile_context>
chip_gen: v7x
topology: tpu7x:2x2x1
jax: 0.10.0
libtpu: 0.0.40
codegen_flags: <defaults>
</compile_context>

<pallas_src>
import jax
import jax.numpy as jnp
import numpy as np
from jax.experimental import pallas as pl
from jax.experimental.pallas import tpu as pltpu


def _head_kernel(cls_ref, ipc_ref, wa_ref, wb_ref, w12a_ref, w2b_ref,
                 bab_ref, b2_ref, out_ref, h2_ref):
    """One grid step == one ffnlayer on the carried h2 accumulator.

    At the last step the fused classifier is applied:
        out = cls @ W12a + h2 @ W2b + b2'
    (W1/b1 were folded into W12a/b2' offline; mathematically exact since the
    original module has no nonlinearity between linear1 and linear2.)
    Weights are bf16 (HBM/DMA savings); MXU accumulation is f32.
    """
    l = pl.program_id(0)

    @pl.when(l == 0)
    def _():
        h2_ref[...] = ipc_ref[...]

    # ffnlayer: h2 = h2 + Linear_b(ReLU(Linear_a(h2)))   (dropout == identity)
    h2 = h2_ref[...]                                              # (B, size) f32
    t = jnp.dot(h2.astype(jnp.bfloat16), wa_ref[...],
                preferred_element_type=jnp.float32) + bab_ref[0:1, :]
    t = jnp.maximum(t, 0.0)
    t = jnp.dot(t.astype(jnp.bfloat16), wb_ref[...],
                preferred_element_type=jnp.float32) + bab_ref[1:2, :]
    h2_ref[...] = h2 + t

    @pl.when(l == pl.num_programs(0) - 1)
    def _():
        out = (jnp.dot(cls_ref[...].astype(jnp.bfloat16), w12a_ref[...],
                       preferred_element_type=jnp.float32)
               + jnp.dot(h2_ref[...].astype(jnp.bfloat16), w2b_ref[...],
                         preferred_element_type=jnp.float32)
               + b2_ref[...])
        out_ref[...] = out.astype(out_ref.dtype)      # lane-dense, unmasked vst


def _compute_vmem_limit(B, size, hidden, numlabel_p):
    """Size the scoped-VMEM limit from actual block sizes (v7x-safe)."""
    bf16, f32 = 2, 4
    # Per-layer streamed blocks (wa + wb + bab), double-buffered by Pallas.
    streamed = 2 * (2 * size * size * bf16 + 2 * size * f32)
    # Resident blocks (constant index maps) + output block + h2 scratch.
    resident = ((hidden + size) * numlabel_p * bf16        # w12a + w2b
                + numlabel_p * f32                         # b2
                + B * (hidden + size) * f32                # cls + ipc
                + B * numlabel_p * f32                     # out block
                + B * size * f32)                          # h2 scratch
    need = streamed + resident
    # 2x headroom for compiler scratch / layout padding, clamped under the
    # 64 MiB physical VMEM of v7x.
    return int(min(max(2 * need, 8 << 20), 56 << 20))


def bertmodel_onetext_forward(text_hidden, ipc, params, numlabel):
    """text_hidden: (B, S, 768) BERT last hidden state;  ipc: (B, size)."""
    B, S, hidden = text_hidden.shape
    size = ipc.shape[1]
    num_layers = params["wa"].shape[0]
    numlabel_p = params["w12a"].shape[1]
    assert num_layers >= 1

    # CLS slice done in the wrapper (6 KiB XLA slice) so every pallas input
    # has a legal block shape (full dim or (8,128)-aligned).
    cls = text_hidden[:, 0, :]                                    # (B, 768)

    in_specs = [
        pl.BlockSpec((B, hidden), lambda l: (0, 0)),              # cls (resident)
        pl.BlockSpec((B, size), lambda l: (0, 0)),                # ipc (resident)
        pl.BlockSpec((None, size, size), lambda l: (l, 0, 0)),    # wa[l] (streamed)
        pl.BlockSpec((None, size, size), lambda l: (l, 0, 0)),    # wb[l] (streamed)
        pl.BlockSpec((hidden, numlabel_p), lambda l: (0, 0)),     # W12a (resident)
        pl.BlockSpec((size, numlabel_p), lambda l: (0, 0)),       # W2b  (resident)
        pl.BlockSpec((None, 2, size), lambda l: (l, 0, 0)),       # bab[l]
        pl.BlockSpec((1, numlabel_p), lambda l: (0, 0)),          # b2'
    ]
    out_spec = pl.BlockSpec((B, numlabel_p), lambda l: (0, 0))    # resident output

    out = pl.pallas_call(
        _head_kernel,
        out_shape=jax.ShapeDtypeStruct((B, numlabel_p), jnp.float32),
        grid=(num_layers,),
        in_specs=in_specs,
        out_specs=out_spec,
        scratch_shapes=[pltpu.VMEM((B, size), jnp.float32)],      # carried h2
        compiler_params=pltpu.CompilerParams(
            dimension_semantics=("arbitrary",),                   # carried reduction
            vmem_limit_bytes=_compute_vmem_limit(B, size, hidden, numlabel_p),
        ),
    )(cls, ipc, params["wa"], params["wb"], params["w12a"], params["w2b"],
      params["bab"], params["b2"])

    return out[:, :numlabel]


def init_params(key, *, numlabel, size, layer, hidden=768):
    """Deterministic synthetic parameters matching the torch module shapes.

    Returns (kernel_params, raw_params):
      kernel_params — folded / lane-padded / bf16 arrays fed to the kernel,
      raw_params    — the un-folded f32 weights for the pure-JAX reference.
    All linear weights are kept in (in, out) orientation.
    """
    assert layer >= 1
    ks = jax.random.split(key, 8)
    scale = 0.02
    numlabel_p = max(128, ((numlabel + 127) // 128) * 128)

    # linear1: (768, 768) (in, out) + bias.
    w1 = scale * jax.random.normal(ks[0], (hidden, hidden), jnp.float32)
    b1 = scale * jax.random.normal(ks[1], (hidden,), jnp.float32)

    # layer x ffnlayer(size): two Linear(size, size) each.
    wa = scale * jax.random.normal(ks[2], (layer, size, size), jnp.float32)
    ba = scale * jax.random.normal(ks[3], (layer, size), jnp.float32)
    wb = scale * jax.random.normal(ks[4], (layer, size, size), jnp.float32)
    bb = scale * jax.random.normal(ks[5], (layer, size), jnp.float32)

    # linear2: (hidden+size, numlabel) (in, out) + bias.
    w2 = scale * jax.random.normal(ks[6], (hidden + size, numlabel), jnp.float32)
    b2 = scale * jax.random.normal(ks[7], (numlabel,), jnp.float32)

    # ---- offline fold of linear1 into linear2 (exact in f32) ----
    w2a, w2b = w2[:hidden], w2[hidden:]
    w12a = w1 @ w2a                      # (hidden, numlabel)
    b2f = b2 + b1 @ w2a                  # (numlabel,)

    def pad_lanes(m):
        out = jnp.zeros(m.shape[:-1] + (numlabel_p,), m.dtype)
        return out.at[..., : m.shape[-1]].set(m)

    kernel_params = dict(
        wa=wa.astype(jnp.bfloat16),
        wb=wb.astype(jnp.bfloat16),
        w12a=pad_lanes(w12a).astype(jnp.bfloat16),
        w2b=pad_lanes(w2b).astype(jnp.bfloat16),
        bab=jnp.stack([ba, bb], axis=1),            # (layer, 2, size) f32
        b2=pad_lanes(b2f)[None, :],                 # (1, numlabel_p) f32
    )
    raw_params = dict(w1=w1, b1=b1, wa=wa, ba=ba, wb=wb, bb=bb, w2=w2, b2=b2)
    return kernel_params, raw_params


def _reference_f32(text_hidden, ipc, raw):
    """Pure-JAX f32 reference mirroring the original PyTorch forward."""
    h = text_hidden[:, 0, :]
    h1 = h @ raw["w1"] + raw["b1"]
    h2 = ipc
    for l in range(raw["wa"].shape[0]):
        t = jnp.maximum(h2 @ raw["wa"][l] + raw["ba"][l], 0.0)
        t = t @ raw["wb"][l] + raw["bb"][l]
        h2 = h2 + t
    h3 = jnp.concatenate([h1, h2], axis=1)
    return h3 @ raw["w2"] + raw["b2"]


if __name__ == "__main__":
    B, S, HIDDEN = 2, 8, 768          # HIDDEN fixed at 768 by the module
    SIZE, LAYER = 128, 2              # 768 + 128 = 896 matches nn.Linear(896, numlabel)
    NUMLABEL = 8

    key = jax.random.PRNGKey(0)
    k_h, k_ipc, k_p = jax.random.split(key, 3)

    text_hidden = jax.random.normal(k_h, (B, S, HIDDEN), jnp.float32)
    ipc = jax.random.normal(k_ipc, (B, SIZE), jnp.float32)
    params, raw = init_params(k_p, numlabel=NUMLABEL, size=SIZE, layer=LAYER,
                              hidden=HIDDEN)

    out = bertmodel_onetext_forward(text_hidden, ipc, params, numlabel=NUMLABEL)
    out = jax.block_until_ready(out)

    ref = _reference_f32(text_hidden, ipc, raw)
    np.testing.assert_allclose(np.asarray(out), np.asarray(ref),
                               rtol=5e-2, atol=5e-2)

    print("KERNEL_OK")
</pallas_src>

<mosaic_0001>
module attributes {stable_mosaic.version = 11 : i64} {
  func.func @_head_kernel(%arg0: i32, %arg1: memref<2x768xf32, #tpu.memory_space<vmem>>, %arg2: memref<2x128xf32, #tpu.memory_space<vmem>>, %arg3: memref<1x128x128xbf16, #tpu.memory_space<vmem>>, %arg4: memref<1x128x128xbf16, #tpu.memory_space<vmem>>, %arg5: memref<768x128xbf16, #tpu.memory_space<vmem>>, %arg6: memref<128x128xbf16, #tpu.memory_space<vmem>>, %arg7: memref<1x2x128xf32, #tpu.memory_space<vmem>>, %arg8: memref<1x128xf32, #tpu.memory_space<vmem>>, %arg9: memref<2x128xf32, #tpu.memory_space<vmem>>, %arg10: memref<2x128xf32, #tpu.memory_space<vmem>>) attributes {dimension_semantics = [#tpu.dimension_semantics<arbitrary>], iteration_bounds = array<i64: 2>, scalar_prefetch = 0 : i64, scratch_operands = 1 : i64, tpu.core_type = #tpu.core_type<tc>, window_params = [{pipeline_mode = #tpu.pipeline_mode<synchronous>, transform_indices = @transform_0, window_bounds = array<i64: 2, 768>}, {pipeline_mode = #tpu.pipeline_mode<synchronous>, transform_indices = @transform_1, window_bounds = array<i64: 2, 128>}, {transform_indices = @transform_2, window_bounds = array<i64: 1, 128, 128>}, {transform_indices = @transform_3, window_bounds = array<i64: 1, 128, 128>}, {pipeline_mode = #tpu.pipeline_mode<synchronous>, transform_indices = @transform_4, window_bounds = array<i64: 768, 128>}, {pipeline_mode = #tpu.pipeline_mode<synchronous>, transform_indices = @transform_5, window_bounds = array<i64: 128, 128>}, {transform_indices = @transform_6, window_bounds = array<i64: 1, 2, 128>}, {pipeline_mode = #tpu.pipeline_mode<synchronous>, transform_indices = @transform_7, window_bounds = array<i64: 1, 128>}, {pipeline_mode = #tpu.pipeline_mode<synchronous>, transform_indices = @transform_8, window_bounds = array<i64: 2, 128>}]} {
    %c0_i32 = arith.constant 0 : i32
    %0 = arith.cmpi eq, %arg0, %c0_i32 : i32
    %1 = arith.extui %0 : i1 to i32
    %c0_i32_0 = arith.constant 0 : i32
    %2 = arith.cmpi ne, %1, %c0_i32_0 : i32
    scf.if %2 {
      %c0_18 = arith.constant 0 : index
      %c0_19 = arith.constant 0 : index
      %27 = vector.load %arg2[%c0_18, %c0_19] : memref<2x128xf32, #tpu.memory_space<vmem>>, vector<2x128xf32>
      %c0_20 = arith.constant 0 : index
      %c0_21 = arith.constant 0 : index
      %28 = vector.load %arg10[%c0_20, %c0_21] : memref<2x128xf32, #tpu.memory_space<vmem>>, vector<2x128xf32>
      tpu.vector_store %arg10[%c0_20, %c0_21], %27 {strides = array<i32>} : memref<2x128xf32, #tpu.memory_space<vmem>>, vector<2x128xf32>,
    } else {
    }
    %c0 = arith.constant 0 : index
    %c0_1 = arith.constant 0 : index
    %3 = vector.load %arg10[%c0, %c0_1] : memref<2x128xf32, #tpu.memory_space<vmem>>, vector<2x128xf32>
    %4 = arith.truncf %3 : vector<2x128xf32> to vector<2x128xbf16>
    %c0_2 = arith.constant 0 : index
    %c0_3 = arith.constant 0 : index
    %c0_4 = arith.constant 0 : index
    %5 = vector.load %arg3[%c0_2, %c0_3, %c0_4] : memref<1x128x128xbf16, #tpu.memory_space<vmem>>, vector<1x128x128xbf16>
    %6 = vector.shape_cast %5 : vector<1x128x128xbf16> to vector<128x128xbf16>
    %cst = arith.constant dense<0.000000e+00> : vector<2x128xf32>
    %7 = tpu.matmul %4, %6, %cst {dimension_numbers = #tpu.dot_dimension_numbers<[1], [0], [0], [1], [0, 0, 1, 1], [], []>} : vector<2x128xbf16>, vector<128x128xbf16>, vector<2x128xf32> -> vector<2x128xf32>
    %c0_5 = arith.constant 0 : index
    %c0_6 = arith.constant 0 : index
    %c0_7 = arith.constant 0 : index
    %8 = vector.load %arg7[%c0_5, %c0_6, %c0_7] : memref<1x2x128xf32, #tpu.memory_space<vmem>>, vector<1x1x128xf32>
    %9 = vector.shape_cast %8 : vector<1x1x128xf32> to vector<1x128xf32>
    %10 = vector.broadcast %9 : vector<1x128xf32> to vector<2x128xf32>
    %11 = arith.addf %7, %10 : vector<2x128xf32>
    %cst_8 = arith.constant 0.000000e+00 : f32
    %12 = vector.broadcast %cst_8 : f32 to vector<2x128xf32>
    %13 = arith.maximumf %11, %12 : vector<2x128xf32>
    %14 = arith.truncf %13 : vector<2x128xf32> to vector<2x128xbf16>
    %c0_9 = arith.constant 0 : index
    %c0_10 = arith.constant 0 : index
    %c0_11 = arith.constant 0 : index
    %15 = vector.load %arg4[%c0_9, %c0_10, %c0_11] : memref<1x128x128xbf16, #tpu.memory_space<vmem>>, vector<1x128x128xbf16>
    %16 = vector.shape_cast %15 : vector<1x128x128xbf16> to vector<128x128xbf16>
    %cst_12 = arith.constant dense<0.000000e+00> : vector<2x128xf32>
    %17 = tpu.matmul %14, %16, %cst_12 {dimension_numbers = #tpu.dot_dimension_numbers<[1], [0], [0], [1], [0, 0, 1, 1], [], []>} : vector<2x128xbf16>, vector<128x128xbf16>, vector<2x128xf32> -> vector<2x128xf32>
    %c0_13 = arith.constant 0 : index
    %c1 = arith.constant 1 : index
    %c0_14 = arith.constant 0 : index
    %18 = vector.load %arg7[%c0_13, %c1, %c0_14] : memref<1x2x128xf32, #tpu.memory_space<vmem>>, vector<1x1x128xf32>
    %19 = vector.shape_cast %18 : vector<1x1x128xf32> to vector<1x128xf32>
    %20 = vector.broadcast %19 : vector<1x128xf32> to vector<2x128xf32>
    %21 = arith.addf %17, %20 : vector<2x128xf32>
    %22 = arith.addf %3, %21 : vector<2x128xf32>
    %c0_15 = arith.constant 0 : index
    %c0_16 = arith.constant 0 : index
    %23 = vector.load %arg10[%c0_15, %c0_16] : memref<2x128xf32, #tpu.memory_space<vmem>>, vector<2x128xf32>
    tpu.vector_store %arg10[%c0_15, %c0_16], %22 {strides = array<i32>} : memref<2x128xf32, #tpu.memory_space<vmem>>, vector<2x128xf32>,
    %c1_i32 = arith.constant 1 : i32
    %24 = arith.cmpi eq, %arg0, %c1_i32 : i32
    %25 = arith.extui %24 : i1 to i32
    %c0_i32_17 = arith.constant 0 : i32
    %26 = arith.cmpi ne, %25, %c0_i32_17 : i32
    scf.if %26 {
      %c0_18 = arith.constant 0 : index
      %c0_19 = arith.constant 0 : index
      %27 = vector.load %arg1[%c0_18, %c0_19] : memref<2x768xf32, #tpu.memory_space<vmem>>, vector<2x768xf32>
      %28 = arith.truncf %27 : vector<2x768xf32> to vector<2x768xbf16>
      %c0_20 = arith.constant 0 : index
      %c0_21 = arith.constant 0 : index
      %29 = vector.load %arg5[%c0_20, %c0_21] : memref<768x128xbf16, #tpu.memory_space<vmem>>, vector<768x128xbf16>
      %cst_22 = arith.constant dense<0.000000e+00> : vector<2x128xf32>
      %30 = tpu.matmul %28, %29, %cst_22 {dimension_numbers = #tpu.dot_dimension_numbers<[1], [0], [0], [1], [0, 0, 1, 1], [], []>} : vector<2x768xbf16>, vector<768x128xbf16>, vector<2x128xf32> -> vector<2x128xf32>
      %c0_23 = arith.constant 0 : index
      %c0_24 = arith.constant 0 : index
      %31 = vector.load %arg10[%c0_23, %c0_24] : memref<2x128xf32, #tpu.memory_space<vmem>>, vector<2x128xf32>
      %32 = arith.truncf %31 : vector<2x128xf32> to vector<2x128xbf16>
      %c0_25 = arith.constant 0 : index
      %c0_26 = arith.constant 0 : index
      %33 = vector.load %arg6[%c0_25, %c0_26] : memref<128x128xbf16, #tpu.memory_space<vmem>>, vector<128x128xbf16>
      %cst_27 = arith.constant dense<0.000000e+00> : vector<2x128xf32>
      %34 = tpu.matmul %32, %33, %cst_27 {dimension_numbers = #tpu.dot_dimension_numbers<[1], [0], [0], [1], [0, 0, 1, 1], [], []>} : vector<2x128xbf16>, vector<128x128xbf16>, vector<2x128xf32> -> vector<2x128xf32>
      %35 = arith.addf %30, %34 : vector<2x128xf32>
      %c0_28 = arith.constant 0 : index
      %c0_29 = arith.constant 0 : index
      %36 = vector.load %arg8[%c0_28, %c0_29] : memref<1x128xf32, #tpu.memory_space<vmem>>, vector<1x128xf32>
      %37 = vector.broadcast %36 : vector<1x128xf32> to vector<2x128xf32>
      %38 = arith.addf %35, %37 : vector<2x128xf32>
      %c0_30 = arith.constant 0 : index
      %c0_31 = arith.constant 0 : index
      %39 = vector.load %arg9[%c0_30, %c0_31] : memref<2x128xf32, #tpu.memory_space<vmem>>, vector<2x128xf32>
      tpu.vector_store %arg9[%c0_30, %c0_31], %38 {strides = array<i32>} : memref<2x128xf32, #tpu.memory_space<vmem>>, vector<2x128xf32>,
    } else {
    }
    return
  }
  func.func @transform_0(%arg0: i32) -> (i32, i32) {
    %c0_i32 = arith.constant 0 : i32
    %c0_i32_0 = arith.constant 0 : i32
    %c0_i32_1 = arith.constant 0 : i32
    return %c0_i32, %c0_i32_0 : i32, i32
  }
  func.func @transform_1(%arg0: i32) -> (i32, i32) {
    %c0_i32 = arith.constant 0 : i32
    %c0_i32_0 = arith.constant 0 : i32
    %c0_i32_1 = arith.constant 0 : i32
    return %c0_i32, %c0_i32_0 : i32, i32
  }
  func.func @transform_2(%arg0: i32) -> (i32, i32, i32) {
    %c0_i32 = arith.constant 0 : i32
    %c0_i32_0 = arith.constant 0 : i32
    %c0_i32_1 = arith.constant 0 : i32
    return %arg0, %c0_i32, %c0_i32_0 : i32, i32, i32
  }
  func.func @transform_3(%arg0: i32) -> (i32, i32, i32) {
    %c0_i32 = arith.constant 0 : i32
    %c0_i32_0 = arith.constant 0 : i32
    %c0_i32_1 = arith.constant 0 : i32
    return %arg0, %c0_i32, %c0_i32_0 : i32, i32, i32
  }
  func.func @transform_4(%arg0: i32) -> (i32, i32) {
    %c0_i32 = arith.constant 0 : i32
    %c0_i32_0 = arith.constant 0 : i32
    %c0_i32_1 = arith.constant 0 : i32
    return %c0_i32, %c0_i32_0 : i32, i32
  }
  func.func @transform_5(%arg0: i32) -> (i32, i32) {
    %c0_i32 = arith.constant 0 : i32
    %c0_i32_0 = arith.constant 0 : i32
    %c0_i32_1 = arith.constant 0 : i32
    return %c0_i32, %c0_i32_0 : i32, i32
  }
  func.func @transform_6(%arg0: i32) -> (i32, i32, i32) {
    %c0_i32 = arith.constant 0 : i32
    %c0_i32_0 = arith.constant 0 : i32
    %c0_i32_1 = arith.constant 0 : i32
    return %arg0, %c0_i32, %c0_i32_0 : i32, i32, i32
  }
  func.func @transform_7(%arg0: i32) -> (i32, i32) {
    %c0_i32 = arith.constant 0 : i32
    %c0_i32_0 = arith.constant 0 : i32
    %c0_i32_1 = arith.constant 0 : i32
    return %c0_i32, %c0_i32_0 : i32, i32
  }
  func.func @transform_8(%arg0: i32) -> (i32, i32) {
    %c0_i32 = arith.constant 0 : i32
    %c0_i32_0 = arith.constant 0 : i32
    %c0_i32_1 = arith.constant 0 : i32
    return %c0_i32, %c0_i32_0 : i32, i32
  }
}

</mosaic_0001>

<bundles_post_ra>
// kernel: tpu_custom_call.1
= control target key start
LH: loop header
LB: loop body
LE: loop exit
PB: predicated region body
PF: predicated region fallthrough
CT: control target
= control target key end

     0   :  { %s2423_s0 = inlined_call_operand.hbm [shape: f32[2,768], index: 0, kind: input, shape index: {}]   ;;  %s2424_s1 = inlined_call_operand.vmem [shape: f32[2,128], index: 1, kind: input, shape index: {}]   ;;  %s2425_s2 = inlined_call_operand.hbm [shape: bf16[2,128,128], index: 2, kind: input, shape index: {}]   ;;  %s2426_s3 = inlined_call_operand.hbm [shape: bf16[2,128,128], index: 3, kind: input, shape index: {}]   ;;  %s2427_s4 = inlined_call_operand.hbm [shape: bf16[768,128], index: 4, kind: input, shape index: {}]   ;;  %s2428_s5 = inlined_call_operand.hbm [shape: bf16[128,128], index: 5, kind: input, shape index: {}]   ;;  %s2429_s6 = inlined_call_operand.vmem [shape: f32[2,2,128], index: 6, kind: input, shape index: {}]   ;;  %s2430_s7 = inlined_call_operand.vmem [shape: f32[1,128], index: 7, kind: input, shape index: {}]   ;;  %s2431_s8 = inlined_call_operand.hbm [shape: f32[2,128], index: 8, kind: output, shape index: {}]  }
   0x1   :  { %2445 = sst [smem:[#allocation20_spill]] %s2424_s1 }
   0x2   :  { %2446 = sst [smem:[#allocation21_spill]] %s2425_s2 }
   0x3   :  { %2447 = sst [smem:[#allocation22_spill]] %s2427_s4 }
   0x4   :  { %2448 = sst [smem:[#allocation23_spill]] %s2430_s7 }
   0x5   :  { %2449 = sst [smem:[#allocation24_spill]] %s2431_s8 }
   0x6   :  { %13 = vsyncpa [#allocation4], 0 }
   0x7   :  { %14 = vsyncpa [#allocation7], 0 }
   0x8   :  { %16 = vsyncpa [#allocation7 + $0x1], 0 }
   0x9   :  { %17 = vsyncpa [#allocation10], 0 }
   0xa   :  { %18 = vsyncpa [#allocation5], 0  ;;  %s2117_s27 = smov 0   ;;  %s2119_s28 = smov 0  }
   0xb   :  { %s2121_s29 = smov 0   ;;  %s2123_s30 = smov 0  }
   0xc LB: > { %2450 = sst [smem:[#allocation17_spill]] %s2053_s29  ;;  %s2136_s9 = sadd.s32 4294967295, %s2057_s30   ;;  %s2057_s30 = sphi %s2123_s30, %s2475_s30   ;;  %s2053_s29 = sphi %s2121_s29, %s2477_s29   ;;  %s2049_s28 = sphi %s2119_s28, %s2479_s28   ;;  %s2045_s27 = sphi %s2117_s27, %s2478_s27  }
   0xd   : > { %p86_p0 = scmp.ne.s32.totalorder %s2049_s28, %s2045_s27  ;;  %p2432_p1 = scmp.eq.s32.totalorder %s2136_s9, 0 }
   0xe   : > { %p1424_p2 = scmp.ge.s32.totalorder %s2057_s30, 1  ;;  %p233_p3 = scmp.lt.s32.totalorder %s2057_s30, 3 }
   0xf   : > { %p2145_p5 = por %p2432_p1, %p86_p0  ;;  %s2059_s12 = smov [#allocation9]  }
  0x10   : > { %p2149_p6 = pnand %p1424_p2, %p233_p3  ;;  %s259_s13 = sshll.u32 %s2059_s12, 4  ;;  %s260_s13 = int_to_ptr.vmem [resolvable:$true] %s259_s13 }
  0x11   : > { %s2451_s10 = scalar_select %p2145_p5, 1, 0 }
  0x12   : > { %s2452_s11 = scalar_select %p2149_p6, 1, 0 }
  0x13   : > { %p1699_p7 = pneg %p2149_p6  ;;  %s2162_s15 = sadd.s32 1, %s2057_s30  }
  0x14   : > { %2454 = sst [smem:[#allocation18_spill]] %s2162_s15  ;;  %s73_s16 = sadd.s32 1, %s2053_s29 }
  0x15   : > { %p2157_p8 = pnand %p1699_p7, %p2432_p1  ;;  %s70_s17 = ssub.s32 %s2057_s30, %s2162_s15 }
  0x16   : > { %s2455_s4 = sld [smem:[#allocation22_spill]] }
  0x17   : > { %s2453_s14 = scalar_select %p2157_p8, 1, 0 }
  0x18   : > { %p2175_p10 = pneg %p2157_p8 }
  0x1c   : > { %s1841_s20 = scalar_lea.hbm %s2455_s4, 6144 }
  0x1d   : > { %p1842_p9 = scmp.ne.s32.totalorder %s2455_s4, %s1841_s20  ;;  %p1848_p13 = scmp.lt.u32.totalorder %s1841_s20, %s2455_s4 }
  0x1f   : > { %p1844_p11 = pnand %p2175_p10, %p1842_p9 }
  0x21   : > { %p1845_p12 = pneg %p1844_p11 }
  0x23   : > { %p1850_p0 = pnand %p1848_p13, %p1845_p12 }
  0x25   : > { %1853 = shalt.err (!%p1850_p0)
}
  0x26   : > { %s1854_s26 = scalar_lea.vmem %s260_s13, 6144  ;;  %p1862_p4 = scmp.lt.s32.totalorder %s260_s13, %s260_s13 }
  0x27   : > { %p1855_p2 = scmp.ne.s32.totalorder %s260_s13, %s1854_s26  ;;  %p1863_p1 = scmp.lt.s32.totalorder %s1854_s26, %s1854_s26 }
  0x29   : > { %p1857_p3 = pnand %p1855_p2, %p2175_p10  ;;  %p1864_p5 = por %p1863_p1, %p1862_p4 }
  0x2b   : > { %p1858_p7 = pneg %p1857_p3 }
  0x2d   : > { %p1865_p6 = pnand %p1864_p5, %p1858_p7 }
  0x2f   : > { %1868 = shalt.err (!%p1865_p6)
}
  0x30   : > { %s2060_s27 = smov 64   ;;  %s2061_s12 = smov 4  }
  0x31   : > { %1705 = dma.hbm_to_vmem [thread:$0]  (!%p2157_p8), %s2455_s4, 6144, %s260_s13, [#allocation10], %s2060_s27, %s2060_s27, %s2061_s12  }
  0x32   : > { %p71_p1 = scmp.eq.s32.totalorder %s70_s17, 0  ;;  %p80_p4 = scmp.ne.s32.totalorder %s2053_s29, %s2049_s28 }
  0x33   : > { %p81_p5 = scmp.eq.s32.totalorder %s2057_s30, 0  ;;  %p1719_p6 = scmp.lt.s32.totalorder %s2057_s30, 2 }
  0x34   : > { %s2199_s20 = scalar_select %p71_p1, %s2053_s29, %s73_s16  }
  0x35   : > { %p82_p9 = por %p81_p5, %p80_p4  ;;  %s289_s21 = sand.u32 1, %s2057_s30  }
  0x36   : > { %2457 = sst [smem:[#allocation19_spill]] %s2199_s20  ;;  %s291_s22 = sand.u32 1, %s2053_s29  }
  0x37   : > { %s2203_s24 = sshll.u32 %s291_s22, 6  ;;  %s2438_s25 = sshll.u32 %s2057_s30, 10 }
  0x38   : > { %s2458_s2 = sld [smem:[#allocation21_spill]]  ;;  %s293_s13 = scalar_lea.vmem [#allocation6], %s2203_s24 }
  0x39   : > { %s300_s16 = sshll.u32 %s293_s13, 4  ;;  %p2214_p11 = pnand %p1719_p6, %p82_p9  ;;  %s2218_s16 = int_to_ptr.vmem [resolvable:$true] %s300_s16 }
  0x3a   : > { %s2220_s18 = scalar_lea.sflag [#allocation7], %s289_s21 }
  0x3b   : > { %s2459_s17 = scalar_select %p2214_p11, 1, 0 }
  0x3c   : > { %p2442_p13 = pneg %p2214_p11 }
  0x3e   : > { %s2211_s8 = scalar_lea.hbm %s2458_s2, %s2438_s25  ;;  %s1874_s26 = scalar_lea.hbm %s2458_s2, 2048 }
  0x3f   : > { %s1869_s19 = scalar_lea.hbm %s2211_s8, 1024  ;;  %p1875_p3 = scmp.lt.u32.totalorder %s2211_s8, %s2458_s2 }
  0x40   : > { %p1870_p12 = scmp.ne.s32.totalorder %s2211_s8, %s1869_s19  ;;  %p1876_p7 = scmp.lt.u32.totalorder %s1874_s26, %s1869_s19 }
  0x41   : > { %p1878_p4 = scmp.lt.u32.totalorder %s1869_s19, %s2211_s8 }
  0x42   : > { %p1872_p0 = pnand %p2442_p13, %p1870_p12  ;;  %p1877_p1 = por %p1876_p7, %p1875_p3 }
  0x44   : > { %p1873_p2 = pneg %p1872_p0  ;;  %p1879_p5 = por %p1878_p4, %p1877_p1 }
  0x46   : > { %p1880_p6 = pnand %p1879_p5, %p1873_p2 }
  0x48   : > { %1883 = shalt.err (!%p1880_p6)
}
  0x49   : > { %s1884_s21 = scalar_lea.vmem %s2218_s16, 1024  ;;  %s2062_s15 = smov [#allocation6]  }
  0x4a   : > { %p1885_p9 = scmp.ne.s32.totalorder %s2218_s16, %s1884_s21  ;;  %s1889_s22 = sshll.u32 %s2062_s15, 4  ;;  %s1890_s22 = int_to_ptr.vmem [resolvable:$false] %s1889_s22 }
  0x4b   : > { %s1891_s25 = scalar_lea.vmem %s1890_s22, 2048  ;;  %p1892_p8 = scmp.lt.s32.totalorder %s2218_s16, %s1890_s22 }
  0x4c   : > { %p1887_p12 = pnand %p1885_p9, %p2442_p13  ;;  %p1893_p3 = scmp.lt.s32.totalorder %s1891_s25, %s1884_s21 }
  0x4e   : > { %p1888_p0 = pneg %p1887_p12  ;;  %p1894_p7 = por %p1893_p3, %p1892_p8 }
  0x50   : > { %p1895_p1 = pnand %p1894_p7, %p1888_p0 }
  0x52   : > { %1898 = shalt.err (!%p1895_p1)
}
  0x53   : > { %1712 = dma.hbm_to_vmem [thread:$0]  (!%p2214_p11), %s2211_s8, 1024, %s2218_s16, %s2220_s18, %s2060_s27, %s2060_s27, %s2061_s12  }
  0x54   : > { %s2460_s19 = sshll.u32 %s2057_s30, 10  ;;  %s314_s15 = scalar_lea.vmem [#allocation8], %s2203_s24 }
  0x55   : > { %s2256_s21 = scalar_lea.hbm %s2426_s3, %s2460_s19  ;;  %s321_s22 = sshll.u32 %s314_s15, 4  ;;  %s2277_s22 = int_to_ptr.vmem [resolvable:$true] %s321_s22 }
  0x56   : > { %s2063_s25 = smov [#allocation3]   ;;  %s1899_s29 = scalar_lea.hbm %s2423_s0, 192 }
  0x57   : > { %s246_s2 = sshll.u32 %s2063_s25, 4  ;;  %p1900_p8 = scmp.ne.s32.totalorder %s2423_s0, %s1899_s29  ;;  %s247_s2 = int_to_ptr.vmem [resolvable:$true] %s246_s2 }
  0x58   : > { %p1906_p5 = scmp.lt.u32.totalorder %s1899_s29, %s2423_s0 }
  0x59   : > { %p1902_p2 = pnand %p1900_p8, %p2175_p10 }
  0x5b   : > { %p1903_p4 = pneg %p1902_p2 }
  0x5d   : > { %p1908_p6 = pnand %p1906_p5, %p1903_p4 }
  0x5f   : > { %1911 = shalt.err (!%p1908_p6)
}
  0x60   : > { %s1912_s24 = scalar_lea.vmem %s247_s2, 192  ;;  %p1920_p3 = scmp.lt.s32.totalorder %s247_s2, %s247_s2 }
  0x61   : > { %p1913_p9 = scmp.ne.s32.totalorder %s247_s2, %s1912_s24  ;;  %p1921_p7 = scmp.lt.s32.totalorder %s1912_s24, %s1912_s24 }
  0x63   : > { %p1915_p12 = pnand %p1913_p9, %p2175_p10  ;;  %p1922_p1 = por %p1921_p7, %p1920_p3 }
  0x65   : > { %p1916_p0 = pneg %p1915_p12 }
  0x67   : > { %p1923_p13 = pnand %p1922_p1, %p1916_p0 }
  0x69   : > { %1926 = shalt.err (!%p1923_p13)
}
  0x6a   : > { %p2461_p8 = scmp.ne.s32.totalorder %s2453_s14, 0  ;;  %s2064_s7 = smov [#allocation11]  }
  0x6b   : > { %s272_s29 = sshll.u32 %s2064_s7, 4  ;;  %s1927_s19 = scalar_lea.hbm %s2428_s5, 1024  ;;  %s273_s29 = int_to_ptr.vmem [resolvable:$true] %s272_s29 }
  0x6c   : > { %1702 = dma.hbm_to_vmem [thread:$0]  (!%p2461_p8), %s2423_s0, 192, %s247_s2, [#allocation4]  }
  0x6d   : > { %p1928_p13 = scmp.ne.s32.totalorder %s2428_s5, %s1927_s19  ;;  %p1934_p5 = scmp.lt.u32.totalorder %s1927_s19, %s2428_s5 }
  0x6f   : > { %p1930_p2 = pnand %p1928_p13, %p2175_p10 }
  0x71   : > { %p1931_p4 = pneg %p1930_p2 }
  0x73   : > { %p1936_p6 = pnand %p1934_p5, %p1931_p4 }
  0x75   : > { %1939 = shalt.err (!%p1936_p6)
}
  0x76   : > { %s1940_s2 = scalar_lea.vmem %s273_s29, 1024  ;;  %p1948_p3 = scmp.lt.s32.totalorder %s273_s29, %s273_s29 }
  0x77   : > { %p1941_p9 = scmp.ne.s32.totalorder %s273_s29, %s1940_s2  ;;  %p1949_p7 = scmp.lt.s32.totalorder %s1940_s2, %s1940_s2 }
  0x79   : > { %p1943_p12 = pnand %p1941_p9, %p2175_p10  ;;  %p1950_p1 = por %p1949_p7, %p1948_p3 }
  0x7b   : > { %p1944_p0 = pneg %p1943_p12 }
  0x7d   : > { %p1951_p11 = pnand %p1950_p1, %p1944_p0 }
  0x7f   : > { %1954 = shalt.err (!%p1951_p11)
}
  0x80   : > { %1708 = dma.hbm_to_vmem [thread:$0]  (!%p2461_p8), %s2428_s5, 1024, %s273_s29, [#allocation10], %s2060_s27, %s2060_s27, %s2061_s12  }
  0x81   : > { %s1955_s23 = scalar_lea.hbm %s2256_s21, 1024  ;;  %p2462_p13 = scmp.ne.s32.totalorder %s2459_s17, 0 }
  0x82   : > { %p1956_p10 = scmp.ne.s32.totalorder %s2256_s21, %s1955_s23  ;;  %s1960_s1 = scalar_lea.hbm %s2426_s3, 2048 }
  0x83   : > { %p2463_p2 = pneg %p2462_p13  ;;  %p1961_p5 = scmp.lt.u32.totalorder %s2256_s21, %s2426_s3 }
  0x84   : > { %p1962_p6 = scmp.lt.u32.totalorder %s1960_s1, %s1955_s23  ;;  %p1964_p12 = scmp.lt.u32.totalorder %s1955_s23, %s2256_s21 }
  0x85   : > { %p1958_p4 = pnand %p1956_p10, %p2463_p2 }
  0x86   : > { %p1963_p9 = por %p1962_p6, %p1961_p5 }
  0x87   : > { %p1959_p11 = pneg %p1958_p4 }
  0x88   : > { %p1965_p0 = por %p1964_p12, %p1963_p9 }
  0x8a   : > { %p1966_p3 = pnand %p1965_p0, %p1959_p11 }
  0x8c   : > { %1969 = shalt.err (!%p1966_p3)
}
  0x8d   : > { %s1970_s29 = scalar_lea.vmem %s2277_s22, 1024  ;;  %p2464_p7 = pmov %p2463_p2 }
  0x8e   : > { %p1971_p8 = scmp.ne.s32.totalorder %s2277_s22, %s1970_s29  ;;  %s2065_s20 = smov [#allocation8]  }
  0x8f   : > { %s1975_s16 = sshll.u32 %s2065_s20, 4  ;;  %s1976_s16 = int_to_ptr.vmem [resolvable:$false] %s1975_s16 }
  0x90   : > { %p1973_p1 = pnand %p1971_p8, %p2464_p7  ;;  %s1977_s19 = scalar_lea.vmem %s1976_s16, 2048 }
  0x91   : > { %p1978_p2 = scmp.lt.s32.totalorder %s2277_s22, %s1976_s16  ;;  %p1979_p4 = scmp.lt.s32.totalorder %s1977_s19, %s1970_s29 }
  0x92   : > { %p1974_p10 = pneg %p1973_p1 }
  0x93   : > { %p1980_p5 = por %p1979_p4, %p1978_p2 }
  0x95   : > { %p1981_p6 = pnand %p1980_p5, %p1974_p10 }
  0x97   : > { %1984 = shalt.err (!%p1981_p6)
}
  0x98   : > { %1715 = dma.hbm_to_vmem [thread:$0]  (!%p2462_p13), %s2256_s21, 1024, %s2277_s22, %s2220_s18, %s2060_s27, %s2060_s27, %s2061_s12  }
  0x99   : > { %p2465_p11 = scmp.ne.s32.totalorder %s2452_s11, 0 }
  0x9a   : > { %p2466_p9 = scmp.eq.s32.totalorder (!%p2465_p11), %s2136_s9, 0 }
  0x9b   : > { %340 = sbr.rel (%p2465_p11) target bundleno = 943 (0x3af), region = 52 }
  0xa2   : > { %2028 = dma.done.wait (%p2466_p9), [#allocation4], 192   ;;  %p2467_p12 = pmov %p2466_p9 }
  0xa3   : > { %s346_s17 = sand.u32 1, %s2136_s9   ;;  %s348_s26 = sand.u32 1, %s2049_s28  }
  0xa4   : > { %2030 = vsyncadd (%p2467_p12), [#allocation4], 4294967104  ;;  %s1437_s13 = sshll.u32 %s348_s26, 6  ;;  %s347_s15 = scalar_lea.sflag [#allocation7], %s346_s17 }
  0xa5   : > { %s2335_s25 = scalar_lea.vmem [#allocation6], %s1437_s13  ;;  %p2468_p0 = scmp.ne.s32.totalorder %s2451_s10, 0 }
  0xa7   : > { %2032 = dma.done.wait (%p2468_p0), %s347_s15, 2048  }
  0xa8   : > { %2034 = vsyncadd (%p2468_p0), %s347_s15, 4294965248  ;;  %s2341_s11 = scalar_lea.vmem [#allocation8], %s1437_s13  ;;  %p2469_p13 = pmov %p2466_p9 }
  0xa9   : > { %p2470_p3 = pmov %p2466_p9 }
  0xaa   : > { %2036 = dma.done.wait (%p2469_p13), [#allocation10], 7168  }
  0xab   : > { %2038 = vsyncadd (%p2470_p3), [#allocation10], 4294960128  ;;  %p404_p8 = scmp.lt.s32.totalorder %s2136_s9, 1  ;;  %p2471_p7 = scmp.ne.s32.totalorder %s2136_s9, 0 }
  0xac   : > { %s2472_s8 = sld [smem:[#allocation20_spill]] (!%p2471_p7) }
  0xad   : > { %s405_s27 = scalar_select %p404_p8, %s2136_s9, 1 }
  0xae   : > { %412 = sbr.rel (%p2471_p7) target bundleno = 181 (0xb5), region = 76 }
  0xaf   : > { %s1441_s12 = sshll.u32 %s405_s27, 1 }
  0xb0   : > { %s2352_s22 = scalar_lea.vmem %s2429_s6, %s1441_s12 }
  0xb2   : > { %v413_v0 = vld [vmem:[%s2472_s8] sm:$0x3] (!%p2471_p7) }
  0xb3   : > { %414 = vst [vmem:[#allocation2] sm:$0x3] (!%p2471_p7), %v413_v0 }
  0xb5 PF: > { %v1768_v1 = vld [vmem:[%s2335_s25] sm:$0xff]   ;;  %v2066_v2 = vmov 0.0   ;;  %v1769_v3 = vld [vmem:[%s2335_s25 + $0x8] sm:$0xff]   ;;  %vm2067_vm0 = vmmov 0   ;;  %v1770_v4 = vld [vmem:[%s2335_s25 + $0x10] sm:$0xff]   ;;  %p1461_p1 = scmp.ne.s32.totalorder %s2136_s9, 1 }
  0xb6   : > { %1619 = vmatprep.subr.bf16.mxu0 %v2066_v2  ;;  %1639 = vmatprep.subr.bf16.mxu1 %v2066_v2  ;;  %v1776_v5 = vld [vmem:[%s2341_s11] sm:$0xff]   ;;  %v1771_v6 = vld [vmem:[%s2335_s25 + $0x18] sm:$0xff]   ;;  %v1777_v7 = vld [vmem:[%s2341_s11 + $0x8] sm:$0xff]   ;;  %v2068_v36 = vmov (!%p1461_p1), 0.0   ;;  %vm2069_vm1 = vmmov (!%p1461_p1), 0   ;;  %v651_v53 = vlaneseq (!%p1461_p1)  ;;  %s2473_s24 = sld [smem:[#allocation23_spill]] (!%p1461_p1) }
  0xb7   : > { %1620 = vmatpush3.bf16.msra.mxu0 %v1768_v1  ;;  %1635 = vmatprep.mubr.msk.bf16.mxu0 %vm2067_vm0, %v2066_v2  ;;  %v1772_v8 = vld [vmem:[%s2335_s25 + $0x20] sm:$0xff]   ;;  %v1778_v9 = vld [vmem:[%s2341_s11 + $0x10] sm:$0xff]   ;;  %v1773_v10 = vld [vmem:[%s2335_s25 + $0x28] sm:$0xff]   ;;  %v2070_v62 = vmov (!%p1461_p1), 1983009808  }
  0xb8   : > { %1621 = vmatprep.subr.bf16.mxu0 %v2066_v2  ;;  %1655 = vmatprep.mubr.msk.bf16.mxu1 %vm2067_vm0, %v2066_v2  ;;  %v1779_v11 = vld [vmem:[%s2341_s11 + $0x18] sm:$0xff]   ;;  %v1774_v12 = vld [vmem:[%s2335_s25 + $0x30] sm:$0xff]   ;;  %v1780_v13 = vld [vmem:[%s2341_s11 + $0x20] sm:$0xff]   ;;  %v652_v58 = vshrl.u32 (!%p1461_p1), %v651_v53, 7  ;;  %v649_v63 = vunpack.c.l.s4 (!%p1461_p1), %v2070_v62 }
  0xb9   : > { %1640 = vmatpush3.bf16.msra.mxu1 %v1776_v5  ;;  %v1775_v14 = vld [vmem:[%s2335_s25 + $0x38] sm:$0xff]   ;;  %v1781_v16 = vld [vmem:[%s2341_s11 + $0x28] sm:$0xff]   ;;  %v1782_v18 = vld [vmem:[%s2341_s11 + $0x30] sm:$0xff]  }
  0xba   : > { %1641 = vmatprep.subr.bf16.mxu1 %v2066_v2  ;;  %v415_v15 = vld [vmem:[#allocation2] sm:$0x3]  ;;  %v1783_v19 = vld [vmem:[%s2341_s11 + $0x38] sm:$0xff]   ;;  %v1784_v35 = vld [vmem:[#allocation11] sm:$0xff] (!%p1461_p1)  }
  0xbb   : > { %1622 = vmatpush3.bf16.msra.mxu0 %v1769_v3  ;;  %v416_v17 = vpack.c.bf16 %v415_v15, %v415_v15  ;;  %v1443_v20 = vld [vmem:[%s2352_s22] ss:$0 sm:$0xff]  ;;  %v1452_v28 = vld [vmem:[%s2352_s22 + $0x1] ss:$0 sm:$0xff]  ;;  %v1785_v37 = vld [vmem:[#allocation9 + $0x40] sm:$0xff] (!%p1461_p1)  }
  0xbc   : > { %1623 = vmatprep.subr.bf16.mxu0 %v2066_v2  ;;  %v1786_v38 = vld [vmem:[#allocation9] sm:$0xff] (!%p1461_p1)   ;;  %v1787_v39 = vld [vmem:[#allocation11 + $0x8] sm:$0xff] (!%p1461_p1)   ;;  %v1790_v42 = vld [vmem:[#allocation11 + $0x10] sm:$0xff] (!%p1461_p1)  }
  0xbd   : > { %1642 = vmatpush3.bf16.msra.mxu1 %v1777_v7  ;;  %v1788_v40 = vld [vmem:[#allocation9 + $0x48] sm:$0xff] (!%p1461_p1)   ;;  %v1791_v43 = vld [vmem:[#allocation9 + $0x50] sm:$0xff] (!%p1461_p1)   ;;  %v1793_v45 = vld [vmem:[#allocation11 + $0x18] sm:$0xff] (!%p1461_p1)  }
  0xbe   : > { %1643 = vmatprep.subr.bf16.mxu1 %v2066_v2  ;;  %v1789_v41 = vld [vmem:[#allocation9 + $0x8] sm:$0xff] (!%p1461_p1)   ;;  %v1792_v44 = vld [vmem:[#allocation9 + $0x10] sm:$0xff] (!%p1461_p1)   ;;  %v1794_v46 = vld [vmem:[#allocation9 + $0x58] sm:$0xff] (!%p1461_p1)  }
  0xbf   : > { %1624 = vmatpush3.bf16.msra.mxu0 %v1770_v4  ;;  %v1795_v47 = vld [vmem:[#allocation9 + $0x18] sm:$0xff] (!%p1461_p1)   ;;  %v1797_v48 = vld [vmem:[#allocation9 + $0x60] sm:$0xff] (!%p1461_p1)   ;;  %v1800_v51 = vld [vmem:[#allocation9 + $0x68] sm:$0xff] (!%p1461_p1)  }
  0xc0   : > { %1625 = vmatprep.subr.bf16.mxu0 %v2066_v2  ;;  %v1796_v49 = vld [vmem:[#allocation11 + $0x20] sm:$0xff] (!%p1461_p1)   ;;  %v1799_v52 = vld [vmem:[#allocation11 + $0x28] sm:$0xff] (!%p1461_p1)   ;;  %v1803_v55 = vld [vmem:[#allocation9 + $0x70] sm:$0xff] (!%p1461_p1)  }
  0xc1   : > { %1644 = vmatpush3.bf16.msra.mxu1 %v1778_v9  ;;  %v1798_v50 = vld [vmem:[#allocation9 + $0x20] sm:$0xff] (!%p1461_p1)   ;;  %v1801_v54 = vld [vmem:[#allocation9 + $0x28] sm:$0xff] (!%p1461_p1)   ;;  %v1802_v56 = vld [vmem:[#allocation11 + $0x30] sm:$0xff] (!%p1461_p1)  }
  0xc2   : > { %1645 = vmatprep.subr.bf16.mxu1 %v2066_v2  ;;  %v1804_v57 = vld [vmem:[#allocation9 + $0x30] sm:$0xff] (!%p1461_p1)   ;;  %v1805_v59 = vld [vmem:[#allocation11 + $0x38] sm:$0xff] (!%p1461_p1)   ;;  %v1809_v3 = vld [vmem:[#allocation9 + $0xc0] sm:$0xff] (!%p1461_p1)  }
  0xc3   : > { %1626 = vmatpush3.bf16.msra.mxu0 %v1771_v6  ;;  %v1806_v60 = vld [vmem:[#allocation9 + $0x78] sm:$0xff] (!%p1461_p1)   ;;  %v1811_v7 = vld [vmem:[#allocation9 + $0x140] sm:$0xff] (!%p1461_p1)  }
  0xc4   : > { %1627 = vmatprep.subr.bf16.mxu0 %v2066_v2  ;;  %v643_v0 = vld [vmem:[#allocation3] sm:$0xff] (!%p1461_p1) }
  0xc5   : > { %1646 = vmatpush3.bf16.msra.mxu1 %v1779_v11  ;;  %v647_v1 = vcombine.high (!%p1461_p1), %v643_v0, %v643_v0  ;;  %v1807_v4 = vld [vmem:[#allocation9 + $0x38] sm:$0xff] (!%p1461_p1)  }
  0xc6   : > { %1647 = vmatprep.subr.bf16.mxu1 %v2066_v2 }
  0xc7   : > { %1628 = vmatpush3.bf16.msra.mxu0 %v1772_v8  ;;  %v1810_v8 = vld [vmem:[#allocation9 + $0x80] sm:$0xff] (!%p1461_p1)  }
  0xc8   : > { %1629 = vmatprep.subr.bf16.mxu0 %v2066_v2 }
  0xc9   : > { %1648 = vmatpush3.bf16.msra.mxu1 %v1780_v13  ;;  %v1812_v13 = vld [vmem:[#allocation9 + $0x100] sm:$0xff] (!%p1461_p1)  }
  0xca   : > { %1649 = vmatprep.subr.bf16.mxu1 %v2066_v2 }
  0xcb   : > { %1630 = vmatpush3.bf16.msra.mxu0 %v1773_v10  ;;  %v1813_v10 = vld [vmem:[#allocation9 + $0xc8] sm:$0xff] (!%p1461_p1)  }
  0xcc   : > { %1631 = vmatprep.subr.bf16.mxu0 %v2066_v2 }
  0xcd   : > { %1650 = vmatpush3.bf16.msra.mxu1 %v1781_v16  ;;  %v1814_v16 = vld [vmem:[#allocation9 + $0x88] sm:$0xff] (!%p1461_p1)  }
  0xce   : > { %1651 = vmatprep.subr.bf16.mxu1 %v2066_v2 }
  0xcf   : > { %1632 = vmatpush3.bf16.msra.mxu0 %v1774_v12 }
  0xd0   : > { %1633 = vmatprep.subr.bf16.mxu0 %v2066_v2 }
  0xd1   : > { %1652 = vmatpush3.bf16.msra.mxu1 %v1782_v18  ;;  %v1817_v18 = vld [vmem:[#allocation9 + $0xd0] sm:$0xff] (!%p1461_p1)  }
  0xd2   : > { %1653 = vmatprep.subr.bf16.mxu1 %v2066_v2  ;;  %v650_v2 = vunpack.c.0.s8 (!%p1461_p1), %v649_v63 }
  0xd3   : > { %1634 = vmatpush3.bf16.msra.mxu0 %v1775_v14 }
  0xd4   : > { %1659 = vmatprep.subr.bf16.mxu0 (!%p1461_p1), %v2068_v36  ;;  %v653_v6 = vsub.s32 (!%p1461_p1), %v650_v2, %v652_v58 }
  0xd5   : > { %1654 = vmatpush3.bf16.msra.mxu1 %v1783_v19 }
  0xd6   : > { %1636 = vmatmul.mubr.bf16.vlgmr.msra.gmra.mrb[0].mxu0 %v416_v17  ;;  %1553 = vmatprep.subr.bf16.mxu1 (!%p1461_p1), %v1785_v37  ;;  %v654_v9 = vrot.slane (!%p1461_p1), %v643_v0, %v653_v6  ;;  %v2378_v11 = vrot.slane (!%p1461_p1), %v647_v1, %v653_v6  ;;  %v1832_v37 = vld [vmem:[#allocation9 + $0x128] sm:$0xff] (!%p1461_p1)   ;;  %v1519_v6 = vld [vmem:[%s2473_s24] ss:$0 sm:$0xff] (!%p1461_p1) }
  0xd7   : > { %1660 = vmatpush3.bf16.msra.mxu0 (!%p1461_p1), %v1784_v35  ;;  %1675 = vmatprep.mubr.msk.bf16.mxu0 (!%p1461_p1), %vm2069_vm1, %v2068_v36  ;;  %v1833_v35 = vld [vmem:[#allocation9 + $0xf0] sm:$0xff] (!%p1461_p1)  }
  0xd8   : > { %1661 = vmatprep.subr.bf16.mxu0 (!%p1461_p1), %v2068_v36  ;;  %v662_v12 = vcombine.high (!%p1461_p1), %v654_v9, %v654_v9  ;;  %v663_v14 = vcombine.high (!%p1461_p1), %v2378_v11, %v2378_v11 }
  0xda   : > { %v679_v17 = vpack.c.bf16 (!%p1461_p1), %v662_v12, %v662_v12  ;;  %v681_v19 = vpack.c.bf16 (!%p1461_p1), %v663_v14, %v663_v14 }
  0xdb   : > { %1662 = vmatpush3.bf16.msra.mxu0 (!%p1461_p1), %v1787_v39  ;;  %v1837_v39 = vld [vmem:[#allocation9 + $0xf8] sm:$0xff] (!%p1461_p1)  }
  0xdc   : > { %1663 = vmatprep.subr.bf16.mxu0 (!%p1461_p1), %v2068_v36 }
  0xdf   : > { %1664 = vmatpush3.bf16.msra.mxu0 (!%p1461_p1), %v1790_v42  ;;  %v1838_v42 = vld [vmem:[#allocation9 + $0xb8] sm:$0xff] (!%p1461_p1)  }
  0xe0   : > { %1665 = vmatprep.subr.bf16.mxu0 (!%p1461_p1), %v2068_v36 }
  0xe3   : > { %1666 = vmatpush3.bf16.msra.mxu0 (!%p1461_p1), %v1793_v45  ;;  %v1839_v45 = vld [vmem:[#allocation9 + $0x178] sm:$0xff] (!%p1461_p1)  }
  0xe4   : > { %1667 = vmatprep.subr.bf16.mxu0 (!%p1461_p1), %v2068_v36 }
  0xe7   : > { %1668 = vmatpush3.bf16.msra.mxu0 (!%p1461_p1), %v1796_v49 }
  0xe8   : > { %1669 = vmatprep.subr.bf16.mxu0 (!%p1461_p1), %v2068_v36 }
  0xeb   : > { %1670 = vmatpush3.bf16.msra.mxu0 (!%p1461_p1), %v1799_v52 }
  0xec   : > { %1671 = vmatprep.subr.bf16.mxu0 (!%p1461_p1), %v2068_v36 }
  0xef   : > { %1672 = vmatpush3.bf16.msra.mxu0 (!%p1461_p1), %v1802_v56 }
  0xf0   : > { %1673 = vmatprep.subr.bf16.mxu0 (!%p1461_p1), %v2068_v36  ;;  %v1831_v36 = vld [vmem:[#allocation9 + $0x168] sm:$0xff] (!%p1461_p1)  }
  0xf3   : > { %1674 = vmatpush3.bf16.msra.mxu0 (!%p1461_p1), %v1805_v59 }
  0xf4   : > { %1575 = vmatprep.subr.bf16.mxu0 (!%p1461_p1), %v1809_v3 }
 0x1a9   : > { %v520_v21 = vpop.f32.mrb[0].mxu0 }
 0x1aa   : > { %v521_v22 = vadd.f32 %v1443_v20, %v520_v21  ;;  %v1637_v23 = vpop.f32.mrb[1].mxu0  ;;  %v1815_v20 = vld [vmem:[#allocation9 + $0x148] sm:$0xff] (!%p1461_p1)  }
 0x1ab   : > { %v523_v24 = vpop.f32.mrb[2].mxu0  ;;  %v1816_v21 = vld [vmem:[#allocation9 + $0x108] sm:$0xff] (!%p1461_p1)   ;;  %v1821_v23 = vld [vmem:[#allocation9 + $0xd8] sm:$0xff] (!%p1461_p1)  }
 0x1ac   : > { %v526_v25 = vmax.f32 %v521_v22, 0.0  ;;  %v1638_v26 = vpop.f32.mrb[3].mxu0  ;;  %v1818_v22 = vld [vmem:[#allocation9 + $0x90] sm:$0xff] (!%p1461_p1)  }
 0x1ad   : > { %v1819_v24 = vld [vmem:[#allocation9 + $0x150] sm:$0xff] (!%p1461_p1)   ;;  %v1822_v26 = vld [vmem:[#allocation9 + $0x98] sm:$0xff] (!%p1461_p1)  }
 0x1ae   : > { %v527_v27 = vpack.c.bf16 %v526_v25, %v526_v25  ;;  %v1820_v25 = vld [vmem:[#allocation9 + $0x110] sm:$0xff] (!%p1461_p1)  }
 0x1b0   : > { %1656 = vmatmul.mubr.bf16.vlgmr.msra.gmra.mrb[0].mxu1 %v527_v27  ;;  %v1825_v27 = vld [vmem:[#allocation9 + $0xe0] sm:$0xff] (!%p1461_p1)  }
 0x1b1   : > { %1554 = vmatpush3.bf16.msra.mxu1 (!%p1461_p1), %v1786_v38  ;;  %1206 = vmatprep.mubr.bf16.mxu1 (!%p1461_p1), %v679_v17  ;;  %v1834_v38 = vld [vmem:[#allocation9 + $0xb0] sm:$0xff] (!%p1461_p1)  }
 0x1b2   : > { %1555 = vmatprep.subr.bf16.mxu1 (!%p1461_p1), %v1788_v40  ;;  %v1835_v40 = vld [vmem:[#allocation9 + $0x170] sm:$0xff] (!%p1461_p1)  }
 0x1b5   : > { %1556 = vmatpush3.bf16.msra.mxu1 (!%p1461_p1), %v1789_v41  ;;  %v1462_v41 = vld.sshfl [vmem:[#allocation3 + $0x8] sm:$0x33 pattern:$0x76325410] (!%p1461_p1) }
 0x1b6   : > { %1557 = vmatprep.subr.bf16.mxu1 (!%p1461_p1), %v1791_v43  ;;  %v671_v43 = vcombine.high (!%p1461_p1), %v1462_v41, %v1462_v41  ;;  %v682_v49 = vpack.c.bf16 (!%p1461_p1), %v1462_v41, %v1462_v41 }
 0x1b9   : > { %1558 = vmatpush3.bf16.msra.mxu1 (!%p1461_p1), %v1792_v44  ;;  %v1836_v44 = vld [vmem:[#allocation9 + $0x130] sm:$0xff] (!%p1461_p1)  }
 0x1ba   : > { %1559 = vmatprep.subr.bf16.mxu1 (!%p1461_p1), %v1794_v46  ;;  %v683_v46 = vpack.c.bf16 (!%p1461_p1), %v671_v43, %v671_v43 }
 0x1bd   : > { %1560 = vmatpush3.bf16.msra.mxu1 (!%p1461_p1), %v1795_v47  ;;  %v680_v47 = vpack.c.bf16 (!%p1461_p1), %v2378_v11, %v2378_v11 }
 0x1be   : > { %1561 = vmatprep.subr.bf16.mxu1 (!%p1461_p1), %v1797_v48  ;;  %v1840_v48 = vld [vmem:[#allocation9 + $0x138] sm:$0xff] (!%p1461_p1)  }
 0x1c1   : > { %1562 = vmatpush3.bf16.msra.mxu1 (!%p1461_p1), %v1798_v50 }
 0x1c2   : > { %1563 = vmatprep.subr.bf16.mxu1 (!%p1461_p1), %v1800_v51 }
 0x1c5   : > { %1564 = vmatpush3.bf16.msra.mxu1 (!%p1461_p1), %v1801_v54 }
 0x1c6   : > { %1565 = vmatprep.subr.bf16.mxu1 (!%p1461_p1), %v1803_v55 }
 0x1c9   : > { %1566 = vmatpush3.bf16.msra.mxu1 (!%p1461_p1), %v1804_v57 }
 0x1ca   : > { %1567 = vmatprep.subr.bf16.mxu1 (!%p1461_p1), %v1806_v60 }
 0x1cd   : > { %1568 = vmatpush3.bf16.msra.mxu1 (!%p1461_p1), %v1807_v4 }
 0x1ce   : > { %1597 = vmatprep.subr.bf16.mxu1 (!%p1461_p1), %v1811_v7 }
 0x282   : > { %642 = sbr.rel (%p1461_p1) target bundleno = 912 (0x390), region = 80 }
 0x283   : > { %v631_v29 = vpop.f32.mrb[0].mxu1 }
 0x284   : > { %v632_v30 = vadd.f32 %v1452_v28, %v631_v29  ;;  %v1657_v31 = vpop.f32.mrb[1].mxu1  ;;  %v1823_v28 = vld [vmem:[#allocation9 + $0x158] sm:$0xff] (!%p1461_p1)  }
 0x285   : > { %v634_v32 = vpop.f32.mrb[2].mxu1  ;;  %v1824_v29 = vld [vmem:[#allocation9 + $0x118] sm:$0xff] (!%p1461_p1)   ;;  %v1829_v31 = vld [vmem:[#allocation9 + $0xe8] sm:$0xff] (!%p1461_p1)  }
 0x286   : > { %v637_v33 = vadd.f32 %v632_v30, %v415_v15  ;;  %v1658_v34 = vpop.f32.mrb[3].mxu1  ;;  %v678_v15 = vpack.c.bf16 (!%p1461_p1), %v654_v9, %v654_v9  ;;  %v1826_v30 = vld [vmem:[#allocation9 + $0xa0] sm:$0xff] (!%p1461_p1)  }
 0x287   : > { %v1827_v32 = vld [vmem:[#allocation9 + $0x160] sm:$0xff] (!%p1461_p1)   ;;  %v1830_v34 = vld [vmem:[#allocation9 + $0xa8] sm:$0xff] (!%p1461_p1)  }
 0x288   : > { %638 = vst [vmem:[#allocation2] sm:$0x3] %v637_v33  ;;  %1207 = vmatmul.mubr.bf16.vlgmr.msra.gmra.mrb[0].mxu1 (!%p1461_p1), %v678_v15  ;;  %v1828_v33 = vld [vmem:[#allocation9 + $0x120] sm:$0xff] (!%p1461_p1)  }
 0x289   : > { %1598 = vmatpush3.bf16.msra.mxu1 %v1812_v13  ;;  %1286 = vmatprep.mubr.bf16.mxu1 %v683_v46 }
 0x28a   : > { %1599 = vmatprep.subr.bf16.mxu1 %v1815_v20 }
 0x28d   : > { %1600 = vmatpush3.bf16.msra.mxu1 %v1816_v21 }
 0x28e   : > { %1601 = vmatprep.subr.bf16.mxu1 %v1819_v24 }
 0x28f   : > { %v780_v61 = vld [vmem:[#allocation2] sm:$0x3] }
 0x290   : > { %v781_v5 = vpack.c.bf16 %v780_v61, %v780_v61 }
 0x291   : > { %1602 = vmatpush3.bf16.msra.mxu1 %v1820_v25 }
 0x292   : > { %1676 = vmatmul.mubr.bf16.vlgmr.msra.gmra.mrb[0].mxu0 %v781_v5  ;;  %1603 = vmatprep.subr.bf16.mxu1 %v1823_v28 }
 0x293   : > { %1576 = vmatpush3.bf16.msra.mxu0 %v1810_v8  ;;  %1246 = vmatprep.mubr.bf16.mxu0 %v681_v19 }
 0x294   : > { %1577 = vmatprep.subr.bf16.mxu0 %v1813_v10 }
 0x295   : > { %1604 = vmatpush3.bf16.msra.mxu1 %v1824_v29 }
 0x296   : > { %1605 = vmatprep.subr.bf16.mxu1 %v1827_v32 }
 0x297   : > { %1578 = vmatpush3.bf16.msra.mxu0 %v1814_v16 }
 0x298   : > { %1579 = vmatprep.subr.bf16.mxu0 %v1817_v18 }
 0x299   : > { %1606 = vmatpush3.bf16.msra.mxu1 %v1828_v33 }
 0x29a   : > { %1607 = vmatprep.subr.bf16.mxu1 %v1831_v36 }
 0x29b   : > { %1580 = vmatpush3.bf16.msra.mxu0 %v1818_v22 }
 0x29c   : > { %1581 = vmatprep.subr.bf16.mxu0 %v1821_v23 }
 0x29d   : > { %1608 = vmatpush3.bf16.msra.mxu1 %v1832_v37 }
 0x29e   : > { %1609 = vmatprep.subr.bf16.mxu1 %v1835_v40 }
 0x29f   : > { %1582 = vmatpush3.bf16.msra.mxu0 %v1822_v26 }
 0x2a0   : > { %1583 = vmatprep.subr.bf16.mxu0 %v1825_v27 }
 0x2a1   : > { %1610 = vmatpush3.bf16.msra.mxu1 %v1836_v44 }
 0x2a2   : > { %1611 = vmatprep.subr.bf16.mxu1 %v1839_v45 }
 0x2a3   : > { %1584 = vmatpush3.bf16.msra.mxu0 %v1826_v30 }
 0x2a4   : > { %1585 = vmatprep.subr.bf16.mxu0 %v1829_v31 }
 0x2a5   : > { %1612 = vmatpush3.bf16.msra.mxu1 %v1840_v48 }
 0x2a7   : > { %1586 = vmatpush3.bf16.msra.mxu0 %v1830_v34 }
 0x2a8   : > { %1587 = vmatprep.subr.bf16.mxu0 %v1833_v35  ;;  %1287 = vmatmul.mubr.bf16.vlgmr.msra.gmra.mrb[4].mxu1 %v682_v49 }
 0x2ab   : > { %1588 = vmatpush3.bf16.msra.mxu0 %v1834_v38 }
 0x2ac   : > { %1589 = vmatprep.subr.bf16.mxu0 %v1837_v39 }
 0x2af   : > { %1590 = vmatpush3.bf16.msra.mxu0 %v1838_v42 }
 0x2b2   : > { %1247 = vmatmul.mubr.bf16.vlgmr.msra.gmra.mrb[4].mxu0 %v680_v47 }
 0x35b   : > { %v1569_v54 = vpop.f32.mrb[0].mxu1 }
 0x35c   : > { %v1570_v55 = vpop.f32.mrb[1].mxu1 }
 0x35d   : > { %v1571_v56 = vadd.f32 %v1570_v55, %v1569_v54  ;;  %v1572_v57 = vpop.f32.mrb[2].mxu1 }
 0x35e   : > { %v1573_v58 = vpop.f32.mrb[3].mxu1 }
 0x365   : > { %v880_v50 = vpop.f32.mrb[0].mxu0 }
 0x366   : > { %v1677_v51 = vpop.f32.mrb[1].mxu0  ;;  %v1209_v59 = vadd.f32 %v1571_v56, %v880_v50 }
 0x367   : > { %v883_v52 = vpop.f32.mrb[2].mxu0 }
 0x368   : > { %v1678_v53 = vpop.f32.mrb[3].mxu0 }
 0x37b   : > { %v1613_v2 = vpop.f32.mrb[4].mxu1 }
 0x37c   : > { %v1614_v3 = vpop.f32.mrb[5].mxu1 }
 0x37d   : > { %v1615_v4 = vadd.f32 %v1614_v3, %v1613_v2  ;;  %v1616_v5 = vpop.f32.mrb[6].mxu1 }
 0x37e   : > { %v1617_v7 = vpop.f32.mrb[7].mxu1 }
 0x385   : > { %v1591_v60 = vpop.f32.mrb[4].mxu0 }
 0x386   : > { %v1592_v61 = vpop.f32.mrb[5].mxu0 }
 0x387   : > { %v1593_v62 = vadd.f32 %v1592_v61, %v1591_v60  ;;  %v1594_v63 = vpop.f32.mrb[6].mxu0 }
 0x388   : > { %v1595_v0 = vpop.f32.mrb[7].mxu0 }
 0x389   : > { %v1249_v1 = vadd.f32 %v1593_v62, %v1209_v59 }
 0x38b   : > { %v1289_v8 = vadd.f32 %v1615_v4, %v1249_v1 }
 0x38d   : > { %v1301_v9 = vadd.f32 %v1519_v6, %v1289_v8 }
 0x38f   : > { %1302 = vst [vmem:[#allocation12] sm:$0x3] %v1301_v9 }
 0x390 PF: > { %p1723_p10 = scmp.eq.s32.totalorder %s2136_s9, 1  ;;  %s2071_s14 = smov [#allocation12]  }
 0x391   : > { %s1310_s1 = sshll.u32 %s2071_s14, 4  ;;  %s1311_s1 = int_to_ptr.vmem [resolvable:$true] %s1310_s1 }
 0x392   : > { %s1985_s4 = scalar_lea.vmem %s1311_s1, 32  ;;  %p1992_p6 = scmp.lt.s32.totalorder %s1311_s1, %s1311_s1 }
 0x393   : > { %p1986_p2 = scmp.ne.s32.totalorder %s1311_s1, %s1985_s4  ;;  %p1993_p11 = scmp.lt.s32.totalorder %s1985_s4, %s1985_s4 }
 0x395   : > { %p1987_p4 = pnand %p1986_p2, %p1723_p10  ;;  %p1994_p9 = por %p1993_p11, %p1992_p6 }
 0x397   : > { %p1988_p5 = pneg %p1987_p4 }
 0x399   : > { %p1995_p12 = pnand %p1994_p9, %p1988_p5 }
 0x39b   : > { %1998 = shalt.err (!%p1995_p12)
}
 0x39c   : > { %s2474_s20 = sld [smem:[#allocation24_spill]] }
 0x3a2   : > { %s1999_s16 = scalar_lea.hbm %s2474_s20, 32 }
 0x3a3   : > { %p2000_p0 = scmp.ne.s32.totalorder %s2474_s20, %s1999_s16  ;;  %p2005_p8 = scmp.lt.u32.totalorder %s1999_s16, %s2474_s20 }
 0x3a5   : > { %p2001_p13 = pnand %p2000_p0, %p1723_p10 }
 0x3a7   : > { %p2002_p3 = pneg %p2001_p13 }
 0x3a9   : > { %p2007_p7 = pnand %p2005_p8, %p2002_p3 }
 0x3ab   : > { %2010 = shalt.err (!%p2007_p7)
}
 0x3ac   : > { %1696 = dma.vmem_to_hbm [thread:$0]  (%p1723_p10), %s1311_s1, 32, %s2474_s20, [#allocation5]  }
 0x3ad   : > { %2040 = dma.done.wait (%p1723_p10), [#allocation5], 32  }
 0x3ae   : > { %2042 = vsyncadd (%p1723_p10), [#allocation5], 4294967264 }
 0x3af PF: > { %s2475_s30 = sld [smem:[#allocation18_spill]]  ;;  %s2476_s11 = sld [smem:[#allocation17_spill]] }
 0x3b0   : > { %s2477_s29 = sld [smem:[#allocation19_spill]]  ;;  %s2478_s27 = smov %s2049_s28 }
 0x3b5   : > { %p21_p1 = scmp.ge.s32.totalorder %s2475_s30, 4   ;;  %s2479_s28 = smov %s2476_s11 }
 0x3b7   :  { %23 = sbr.rel (!%p21_p1) target bundleno = 12 (0xc), region = 124 }
 0x3be   :  { %1323 = vsyncpa [#allocation4], 1 }
 0x3bf   :  { %1325 = vsyncpa [#allocation4 + $0x1], 1 }
 0x3c0   :  { %1326 = vsyncpa [#allocation7], 1 }
 0x3c1   :  { %1328 = vsyncpa [#allocation7 + $0x1], 1 }
 0x3c2   :  { %1329 = vsyncpa [#allocation10], 1 }
 0x3c3   :  { %1330 = vsyncpa [#allocation5], 1 }
 0x3c4   :  { %1332 = vsyncpa [#allocation5 + $0x1], 1 }

</bundles_post_ra>
